<compile_context>
chip_gen: v7x
topology: tpu7x:2x2x1
jax: 0.10.0
libtpu: 0.0.40
codegen_flags: <defaults>
</compile_context>

<pallas_src>
import functools

import jax
import jax.numpy as jnp
from jax.experimental import pallas as pl
from jax.experimental.pallas import tpu as pltpu


# ---------------------------------------------------------------------------
# Pallas kernel: one (OC_pad, TP) output tile = (OC_pad, K_pad) @ (K_pad, TP).
# Full K is VMEM-resident, so a single MXU dot per tile (bf16 in, f32 acc).
# ---------------------------------------------------------------------------
def condconv_matmul_kernel(wmix_ref, patches_ref, out_ref):
    # wmix_ref:    (OC_pad, K_pad) bf16 -- per-sample mixed weight (resident)
    # patches_ref: (K_pad, TP)     bf16 -- streaming im2col^T tile
    # out_ref:     (OC_pad, TP)    out dtype (f32 here)
    out_ref[...] = jnp.dot(
        wmix_ref[...], patches_ref[...],
        preferred_element_type=jnp.float32,
    ).astype(out_ref.dtype)


# ---------------------------------------------------------------------------
# Wrapper helpers
# ---------------------------------------------------------------------------
def _round_up(x, m):
    return (x + m - 1) // m * m


def compute_pad(h, w, sh, sw, fh, fw):
    # Mirrors CondConv2d.compute_osize (pad=True): (left, right, top, bottom).
    nh = h if sh == 1 else h // 2 + (h % 2 > 0)
    nw = w if sw == 1 else w // 2 + (w % 2 > 0)
    ph = max((nh - 1) * sh + fh - h, 0)
    pw = max((nw - 1) * sw + fw - w, 0)
    return (pw - pw // 2, pw // 2, ph - ph // 2, ph // 2)


def im2col_t(xp, fh, fw, sh, sw):
    """Transposed im2col: (N, K, P) with K-order (ic, fh, fw), P = oh*ow.

    Built by stacking NCHW strided slices along a new axis right after C, so
    no large transpose of the fh*fw-inflated array is needed.
    """
    N, C, Hp, Wp = xp.shape
    oh = (Hp - fh) // sh + 1
    ow = (Wp - fw) // sw + 1
    cols = []
    for i in range(fh):
        for j in range(fw):
            cols.append(xp[:, :, i:i + sh * (oh - 1) + 1:sh,
                           j:j + sw * (ow - 1) + 1:sw])
    p = jnp.stack(cols, axis=2)                       # (N, C, fh*fw, oh, ow)
    return p.reshape(N, C * fh * fw, oh * ow), oh, ow


def condconv2d(x, rws, weight, strides=(1, 1), pad=True):
    N, C, H, W = x.shape
    E, OC, IC, fh, fw = weight.shape
    assert IC == C, "only groups=1 is implemented"
    sh, sw = strides
    out_dtype = x.dtype

    # --- routing (hoisted; f32 to match the PyTorch f32 path) ---------------
    pooled = jnp.mean(x.astype(jnp.float32), axis=(2, 3))       # (N, C)
    routing = jax.nn.sigmoid(pooled @ rws.astype(jnp.float32))  # (N, E)

    # --- per-sample mixed conv weight, OC-major: (N, OC, K), K=(ic,fh,fw) ---
    w_flat = weight.astype(jnp.float32).reshape(E, OC, IC * fh * fw)
    wmix = jnp.einsum('ne,eok->nok', routing, w_flat)           # (N, OC, K)
    wmix = wmix.astype(jnp.bfloat16)                            # bf16 MXU operand

    # --- im2col^T patches of the (optionally padded) input, bf16 ------------
    if pad:
        p_l, p_r, p_t, p_b = compute_pad(H, W, sh, sw, fh, fw)
        xp = jnp.pad(x, ((0, 0), (0, 0), (p_t, p_b), (p_l, p_r)))
    else:
        xp = x
    patches_t, oh, ow = im2col_t(xp.astype(jnp.bfloat16), fh, fw, sh, sw)
    P, K = oh * ow, IC * fh * fw                                # (N, K, P)

    # --- tiling: OC on sublanes (pad to 16 for bf16), P lane-dense ----------
    OC_pad = _round_up(OC, 16)
    K_pad = _round_up(K, 128)
    # TP: multiple of 128, <= 512, minimizing P padding (prefer larger tile).
    TP = min((512, 384, 256, 128), key=lambda t: (_round_up(P, t), -t))
    P_pad = _round_up(P, TP)

    wmix = jnp.pad(wmix, ((0, 0), (0, OC_pad - OC), (0, K_pad - K)))
    patches_t = jnp.pad(patches_t, ((0, 0), (0, K_pad - K), (0, P_pad - P)))

    grid = (N, P_pad // TP)

    # Explicit VMEM budget: patches & out double-buffered, weight resident
    # (bf16 halves every buffer).  v5e defaults to 16 MiB scoped, v7x to
    # 32 MiB of 64 MiB physical.
    vmem_need = (2 * K_pad * TP * 2           # patches, bf16, 2 buffers
                 + 2 * OC_pad * K_pad * 2     # wmix, bf16, 2 buffers (default)
                 + 2 * OC_pad * TP * 4)       # out tile, f32, 2 buffers
    vmem_limit = int(min(64 * 2**20, max(32 * 2**20, vmem_need * 5 // 4)))

    out = pl.pallas_call(
        condconv_matmul_kernel,
        out_shape=jax.ShapeDtypeStruct((N, OC_pad, P_pad), out_dtype),
        grid_spec=pltpu.PrefetchScalarGridSpec(
            num_scalar_prefetch=0,
            grid=grid,
            in_specs=[
                # per-sample mixed weight: constant block index across p
                # -> DMA'd once per sample, stays VMEM-resident.
                pl.BlockSpec((None, OC_pad, K_pad), lambda n, p: (n, 0, 0)),
                # streaming im2col^T tile (lane-dense on P)
                pl.BlockSpec((None, K_pad, TP), lambda n, p: (n, 0, p)),
            ],
            out_specs=pl.BlockSpec((None, OC_pad, TP), lambda n, p: (n, 0, p)),
        ),
        compiler_params=pltpu.CompilerParams(
            dimension_semantics=("parallel", "parallel"),
            vmem_limit_bytes=vmem_limit),
    )(wmix, patches_t)

    # (N, OC_pad, P_pad) -> (N, OC, OH, OW): slice + reshape, no transpose.
    return out[:, :OC, :P].reshape(N, OC, oh, ow)


# ---------------------------------------------------------------------------
# Pure-JAX reference of the PyTorch forward (per-sample mixed-weight conv).
# ---------------------------------------------------------------------------
def ref_condconv2d(x, rws, weight, strides=(1, 1), pad=True):
    N, C, H, W = x.shape
    E, OC, IC, fh, fw = weight.shape
    pooled = x.mean(axis=(2, 3))
    routing = jax.nn.sigmoid(pooled @ rws)
    ws = jnp.einsum('ne,eoikl->noikl', routing, weight)
    sh, sw = strides
    if pad:
        p_l, p_r, p_t, p_b = compute_pad(H, W, sh, sw, fh, fw)
        xp = jnp.pad(x, ((0, 0), (0, 0), (p_t, p_b), (p_l, p_r)))
    else:
        xp = x

    def one(xi, wi):
        return jax.lax.conv_general_dilated(
            xi[None], wi, window_strides=(sh, sw), padding='VALID',
            dimension_numbers=('NCHW', 'OIHW', 'NCHW'))[0]

    return jax.vmap(one)(xp, ws)


if __name__ == "__main__":
    key = jax.random.PRNGKey(0)
    k1, k2, k3 = jax.random.split(key, 3)

    # Primary small config.
    N, C, H, W = 2, 4, 16, 16
    E, OC, FS = 4, 8, 3
    x = jax.random.normal(k1, (N, C, H, W), dtype=jnp.float32)
    rws = jax.random.normal(k2, (C, E), dtype=jnp.float32) * (2.0 / E) ** 0.5 * 0.1
    weight = (jax.random.normal(k3, (E, OC, C, FS, FS), dtype=jnp.float32)
              * (2.0 / (C * FS * FS)) ** 0.5 * 0.1)

    out = jax.block_until_ready(jax.jit(condconv2d)(x, rws, weight))
    ref = ref_condconv2d(x, rws, weight)
    assert out.shape == (N, OC, H, W), out.shape
    # bf16 operands + f32 accumulation -> looser tolerance than the f32 path.
    assert jnp.allclose(out, ref, atol=2e-2, rtol=2e-2), \
        float(jnp.max(jnp.abs(out - ref)))

    # Second small config: larger K (multi-128 contraction) and stride-2 pad.
    k4, k5, k6 = jax.random.split(jax.random.PRNGKey(1), 3)
    N2, C2, H2, W2 = 2, 64, 10, 10
    E2, OC2, FS2 = 4, 16, 3
    x2 = jax.random.normal(k4, (N2, C2, H2, W2), dtype=jnp.float32)
    rws2 = jax.random.normal(k5, (C2, E2), dtype=jnp.float32) * (2.0 / E2) ** 0.5 * 0.1
    w2 = (jax.random.normal(k6, (E2, OC2, C2, FS2, FS2), dtype=jnp.float32)
          * (2.0 / (C2 * FS2 * FS2)) ** 0.5 * 0.1)
    out2 = jax.block_until_ready(
        jax.jit(functools.partial(condconv2d, strides=(2, 2)))(x2, rws2, w2))
    ref2 = ref_condconv2d(x2, rws2, w2, strides=(2, 2))
    assert out2.shape == ref2.shape, (out2.shape, ref2.shape)
    assert jnp.allclose(out2, ref2, atol=2e-2, rtol=2e-2), \
        float(jnp.max(jnp.abs(out2 - ref2)))

    print("KERNEL_OK")
</pallas_src>

<mosaic_0001>
module attributes {stable_mosaic.version = 11 : i64} {
  func.func @condconv_matmul_kernel(%arg0: i32, %arg1: i32, %arg2: memref<1x16x128xbf16, #tpu.memory_space<vmem>>, %arg3: memref<1x128x256xbf16, #tpu.memory_space<vmem>>, %arg4: memref<1x16x256xf32, #tpu.memory_space<vmem>>) attributes {dimension_semantics = [#tpu.dimension_semantics<parallel>, #tpu.dimension_semantics<parallel>], iteration_bounds = array<i64: 2, 1>, scalar_prefetch = 0 : i64, scratch_operands = 0 : i64, tpu.core_type = #tpu.core_type<tc>, window_params = [{transform_indices = @transform_0, window_bounds = array<i64: 1, 16, 128>}, {transform_indices = @transform_1, window_bounds = array<i64: 1, 128, 256>}, {transform_indices = @transform_2, window_bounds = array<i64: 1, 16, 256>}]} {
    %c0 = arith.constant 0 : index
    %c0_0 = arith.constant 0 : index
    %c0_1 = arith.constant 0 : index
    %0 = vector.load %arg2[%c0, %c0_0, %c0_1] : memref<1x16x128xbf16, #tpu.memory_space<vmem>>, vector<1x16x128xbf16>
    %1 = vector.shape_cast %0 : vector<1x16x128xbf16> to vector<16x128xbf16>
    %c0_2 = arith.constant 0 : index
    %c0_3 = arith.constant 0 : index
    %c0_4 = arith.constant 0 : index
    %2 = vector.load %arg3[%c0_2, %c0_3, %c0_4] : memref<1x128x256xbf16, #tpu.memory_space<vmem>>, vector<1x128x256xbf16>
    %3 = vector.shape_cast %2 : vector<1x128x256xbf16> to vector<128x256xbf16>
    %cst = arith.constant dense<0.000000e+00> : vector<16x256xf32>
    %4 = tpu.matmul %1, %3, %cst {dimension_numbers = #tpu.dot_dimension_numbers<[1], [0], [0], [1], [0, 0, 1, 1], [], []>} : vector<16x128xbf16>, vector<128x256xbf16>, vector<16x256xf32> -> vector<16x256xf32>
    %c0_5 = arith.constant 0 : index
    %c0_6 = arith.constant 0 : index
    %c0_7 = arith.constant 0 : index
    %5 = vector.load %arg4[%c0_5, %c0_6, %c0_7] : memref<1x16x256xf32, #tpu.memory_space<vmem>>, vector<1x16x256xf32>
    %6 = vector.shape_cast %5 : vector<1x16x256xf32> to vector<16x256xf32>
    %7 = vector.shape_cast %4 : vector<16x256xf32> to vector<1x16x256xf32>
    tpu.vector_store %arg4[%c0_5, %c0_6, %c0_7], %7 {strides = array<i32>} : memref<1x16x256xf32, #tpu.memory_space<vmem>>, vector<1x16x256xf32>,
    return
  }
  func.func @transform_0(%arg0: i32, %arg1: i32) -> (i32, i32, i32) {
    %c0_i32 = arith.constant 0 : i32
    %c0_i32_0 = arith.constant 0 : i32
    %c0_i32_1 = arith.constant 0 : i32
    return %arg0, %c0_i32, %c0_i32_0 : i32, i32, i32
  }
  func.func @transform_1(%arg0: i32, %arg1: i32) -> (i32, i32, i32) {
    %c0_i32 = arith.constant 0 : i32
    %c0_i32_0 = arith.constant 0 : i32
    return %arg0, %c0_i32, %arg1 : i32, i32, i32
  }
  func.func @transform_2(%arg0: i32, %arg1: i32) -> (i32, i32, i32) {
    %c0_i32 = arith.constant 0 : i32
    %c0_i32_0 = arith.constant 0 : i32
    return %arg0, %c0_i32, %arg1 : i32, i32, i32
  }
}

</mosaic_0001>

<bundles_post_ra>
// kernel: condconv2d.1
= control target key start
LH: loop header
LB: loop body
LE: loop exit
PB: predicated region body
PF: predicated region fallthrough
CT: control target
= control target key end

     0   :  { %s577_s9 = smov 0   ;;  %s579_s10 = smov 0   ;;  %s636_s0 = inlined_call_operand.vmem [shape: bf16[2,16,128], index: 0, kind: input, shape index: {}]   ;;  %s637_s1 = inlined_call_operand.vmem [shape: bf16[2,128,256], index: 1, kind: input, shape index: {}]   ;;  %s638_s2 = inlined_call_operand.vmem [shape: f32[2,16,256], index: 2, kind: output, shape index: {}]  }
   0x1   :  { %s581_s11 = smov 0  }
   0x2 LB: > { %s24_s12 = sadd.s32 1, %s555_s10  ;;  %p458_p0 = scmp.ge.s32.totalorder %s559_s11, 1  ;;  %s559_s11 = sphi %s581_s11, %s12_s11   ;;  %s555_s10 = sphi %s579_s10, %s640_s10   ;;  %s551_s9 = sphi %s577_s9, %s639_s9  }
   0x3   : > { %p26_p1 = scmp.ge.s32.totalorder %s24_s12, 2  ;;  %p143_p2 = scmp.lt.s32.totalorder %s559_s11, 3 }
   0x5   : > { %s642_s12 = smov (%p26_p1, %s24_s12), 0  ;;  %p144_p3 = pnand %p458_p0, %p143_p2 }
   0x6   : > { %p178_p4 = scmp.lt.s32.totalorder (!%p144_p3), %s551_s9, 1  ;;  %v561_v0 = vmov (!%p144_p3), 0  }
   0x7   : > { %147 = sbr.rel (%p144_p3) target bundleno = 266 (0x10a), region = 28  ;;  %340 = vmatprep.mubr.bf16.mxu0 (!%p144_p3), %v561_v0 }
   0xe   : > { %s644_s9 = smov (!%p178_p4, %s551_s9), 1 }
   0xf   : > { %s485_s13 = sshll.u32 %s644_s9, 7  ;;  %s484_s17 = sshll.u32 %s644_s9, 3 }
  0x10   : > { %s601_s16 = scalar_lea.vmem %s637_s1, %s485_s13  ;;  %s182_s20 = scalar_lea.vmem %s636_s0, %s484_s17 }
  0x11   : > { %v512_v1 = vld [vmem:[%s601_s16 + $0x4] ss:$8 sps:$4 sm:$0xff]   ;;  %v514_v2 = vld [vmem:[%s601_s16] ss:$8 sps:$4 sm:$0xff]   ;;  %v515_v3 = vld [vmem:[%s601_s16 + $0x14] ss:$8 sps:$4 sm:$0xff]  }
  0x12   : > { %308 = vmatprep.subr.bf16.mxu0 %v512_v1  ;;  %v517_v4 = vld [vmem:[%s601_s16 + $0x10] ss:$8 sps:$4 sm:$0xff]   ;;  %v518_v5 = vld [vmem:[%s601_s16 + $0x24] ss:$8 sps:$4 sm:$0xff]   ;;  %v520_v6 = vld [vmem:[%s601_s16 + $0x20] ss:$8 sps:$4 sm:$0xff]  }
  0x13   : > { %309 = vmatpush1.bf16.msra.mxu0 %v514_v2  ;;  %v521_v7 = vld [vmem:[%s601_s16 + $0x34] ss:$8 sps:$4 sm:$0xff]   ;;  %v523_v8 = vld [vmem:[%s601_s16 + $0x30] ss:$8 sps:$4 sm:$0xff]   ;;  %v524_v9 = vld [vmem:[%s601_s16 + $0x44] ss:$8 sps:$4 sm:$0xff]  }
  0x14   : > { %310 = vmatprep.subr.bf16.mxu0 %v515_v3  ;;  %v526_v10 = vld [vmem:[%s601_s16 + $0x40] ss:$8 sps:$4 sm:$0xff]   ;;  %v527_v11 = vld [vmem:[%s601_s16 + $0x54] ss:$8 sps:$4 sm:$0xff]   ;;  %v529_v12 = vld [vmem:[%s601_s16 + $0x50] ss:$8 sps:$4 sm:$0xff]  }
  0x15   : > { %v530_v13 = vld [vmem:[%s601_s16 + $0x64] ss:$8 sps:$4 sm:$0xff]   ;;  %v532_v14 = vld [vmem:[%s601_s16 + $0x60] ss:$8 sps:$4 sm:$0xff]   ;;  %v533_v15 = vld [vmem:[%s601_s16 + $0x74] ss:$8 sps:$4 sm:$0xff]  }
  0x16   : > { %v535_v16 = vld [vmem:[%s601_s16 + $0x70] ss:$8 sps:$4 sm:$0xff]   ;;  %v536_v17 = vld [vmem:[%s182_s20] sm:$0xff]   ;;  %s486_s21 = sshll.u32 %s644_s9, 5 }
  0x17   : > { %311 = vmatpush1.bf16.msra.mxu0 %v517_v4  ;;  %s201_s24 = scalar_lea.vmem %s638_s2, %s486_s21 }
  0x18   : > { %312 = vmatprep.subr.bf16.mxu0 %v518_v5 }
  0x1b   : > { %313 = vmatpush1.bf16.msra.mxu0 %v520_v6 }
  0x1c   : > { %314 = vmatprep.subr.bf16.mxu0 %v521_v7 }
  0x1f   : > { %315 = vmatpush1.bf16.msra.mxu0 %v523_v8 }
  0x20   : > { %316 = vmatprep.subr.bf16.mxu0 %v524_v9 }
  0x23   : > { %317 = vmatpush1.bf16.msra.mxu0 %v526_v10 }
  0x24   : > { %318 = vmatprep.subr.bf16.mxu0 %v527_v11 }
  0x27   : > { %319 = vmatpush1.bf16.msra.mxu0 %v529_v12 }
  0x28   : > { %320 = vmatprep.subr.bf16.mxu0 %v530_v13 }
  0x2b   : > { %321 = vmatpush1.bf16.msra.mxu0 %v532_v14 }
  0x2c   : > { %322 = vmatprep.subr.bf16.mxu0 %v533_v15 }
  0x2f   : > { %323 = vmatpush1.bf16.msra.mxu0 %v535_v16 }
  0x32   : > { %341 = vmatmul.mubr.bf16.vlgmr.msra.gmra.mrb[0].mxu0 %v536_v17 }
 0x105   : > { %v342_v18 = vpop.f32.mrb[0].mxu0 }
 0x106   : > { %351 = vst [vmem:[%s201_s24] sm:$0xff] %v342_v18  ;;  %v344_v19 = vpop.f32.mrb[1].mxu0 }
 0x107   : > { %352 = vst [vmem:[%s201_s24 + $0x8] sm:$0xff] %v344_v19  ;;  %v346_v20 = vpop.f32.mrb[2].mxu0 }
 0x108   : > { %353 = vst [vmem:[%s201_s24 + $0x10] sm:$0xff] %v346_v20  ;;  %v348_v21 = vpop.f32.mrb[3].mxu0 }
 0x109   : > { %354 = vst [vmem:[%s201_s24 + $0x18] sm:$0xff] %v348_v21 }
 0x10a PF: > { %s12_s11 = sadd.s32 1, %s559_s11   ;;  %s639_s9 = smov %s555_s10 }
 0x10b   : > { %p9_p5 = scmp.ge.s32.totalorder %s12_s11, 4   ;;  %s640_s10 = smov %s642_s12 }
 0x10d   :  { %11 = sbr.rel (!%p9_p5) target bundleno = 2 (0x2), region = 61 }

</bundles_post_ra>
